<compile_context>
chip_gen: v7x
topology: tpu7x:2x2x1
jax: 0.10.0
libtpu: 0.0.40
codegen_flags: <defaults>
</compile_context>

<pallas_src>
import jax
import jax.numpy as jnp
from jax.experimental import pallas as pl
from jax.experimental.pallas import tpu as pltpu


# ----------------------------- small helpers --------------------------------
def _round_up(x, m):
    return ((x + m - 1) // m) * m


def _pad2(a, shape):
    return jnp.pad(a, ((0, shape[0] - a.shape[0]), (0, shape[1] - a.shape[1])))


def _sublane_multiple(dtype):
    # min second-minor tile: 8 for 4-byte, 16 for 2-byte, 32 for 1-byte dtypes
    return {4: 8, 2: 16, 1: 32}[jnp.dtype(dtype).itemsize]


# ------------------------------- the kernel ---------------------------------
def _generator_mlp_kernel(xc_ref, w1_ref, b1_ref, w2_ref, b2_ref, w3_ref, b3_ref,
                          o_ref):
    """Fused 3-layer MLP: (Linear -> ReLU) x2 -> Linear.

    Operands may be bf16; all matmuls accumulate in f32. Biases are f32.
    Padded feature columns carry exact zeros end-to-end (weights/biases are
    zero-padded), so they contribute nothing to the real outputs.
    """
    h1 = jnp.dot(xc_ref[...], w1_ref[...], preferred_element_type=jnp.float32)
    h1 = jnp.maximum(h1 + b1_ref[...], 0.0)

    h2 = jnp.dot(h1.astype(w2_ref.dtype), w2_ref[...],
                 preferred_element_type=jnp.float32)
    h2 = jnp.maximum(h2 + b2_ref[...], 0.0)

    out = jnp.dot(h2.astype(w3_ref.dtype), w3_ref[...],
                  preferred_element_type=jnp.float32)
    o_ref[...] = (out + b3_ref[...]).astype(o_ref.dtype)


# --------------------------- param preparation -------------------------------
def init_generator_params(key, input_size, hidden_size, output_size, condition_size):
    """Deterministic init matching nn.Linear shapes (weights stored as [in, out])."""
    in_dim = input_size + condition_size
    k1, k2, k3, k4, k5, k6 = jax.random.split(key, 6)

    def linear_init(kw, kb, fan_in, fan_out):
        bound = 1.0 / jnp.sqrt(fan_in)
        w = jax.random.uniform(kw, (fan_in, fan_out), jnp.float32, -bound, bound)
        b = jax.random.uniform(kb, (1, fan_out), jnp.float32, -bound, bound)
        return w, b

    w1, b1 = linear_init(k1, k2, in_dim, hidden_size)
    w2, b2 = linear_init(k3, k4, hidden_size, hidden_size)
    w3, b3 = linear_init(k5, k6, hidden_size, output_size)
    return (w1, b1, w2, b2, w3, b3)


def prepare_params(params, *, compute_dtype=jnp.bfloat16):
    """One-time padding (feature dims -> multiple of 128) and dtype cast.

    Doing this once (instead of per forward call) removes an extra HBM
    read+write pass over all weights from every forward.
    """
    w1, b1, w2, b2, w3, b3 = params
    in_total, hidden = w1.shape
    out_dim = w3.shape[1]
    hidden_p = _round_up(hidden, 128)
    out_p = _round_up(out_dim, 128)

    prepared = dict(
        w1=_pad2(w1, (in_total, hidden_p)).astype(compute_dtype),
        b1=_pad2(b1.reshape(1, -1), (1, hidden_p)).astype(jnp.float32),
        w2=_pad2(w2, (hidden_p, hidden_p)).astype(compute_dtype),
        b2=_pad2(b2.reshape(1, -1), (1, hidden_p)).astype(jnp.float32),
        w3=_pad2(w3, (hidden_p, out_p)).astype(compute_dtype),
        b3=_pad2(b3.reshape(1, -1), (1, out_p)).astype(jnp.float32),
        in_total=in_total, hidden=hidden, out_dim=out_dim,
        hidden_p=hidden_p, out_p=out_p, compute_dtype=jnp.dtype(compute_dtype),
    )
    return prepared


# ------------------------------ forward pass ---------------------------------
def _build_pallas_call(bt, b_pad, in_total, hidden_p, out_p, out_dtype,
                       vmem_limit, buffered_weights):
    if buffered_weights:
        def w_spec(shape):
            # Grid-invariant: fetched once; single-buffered to halve VMEM use.
            return pl.BlockSpec(shape, lambda i: (0, 0),
                                pipeline_mode=pl.Buffered(1))
    else:
        def w_spec(shape):
            return pl.BlockSpec(shape, lambda i: (0, 0))

    return pl.pallas_call(
        _generator_mlp_kernel,
        out_shape=jax.ShapeDtypeStruct((b_pad, out_p), out_dtype),
        grid_spec=pltpu.PrefetchScalarGridSpec(
            num_scalar_prefetch=0,
            grid=(b_pad // bt,),
            in_specs=[
                pl.BlockSpec((bt, in_total), lambda i: (i, 0)),  # [x | cond] tile
                w_spec((in_total, hidden_p)),                    # W1
                w_spec((1, hidden_p)),                           # b1 (f32)
                w_spec((hidden_p, hidden_p)),                    # W2
                w_spec((1, hidden_p)),                           # b2 (f32)
                w_spec((hidden_p, out_p)),                       # W3
                w_spec((1, out_p)),                              # b3 (f32)
            ],
            out_specs=pl.BlockSpec((bt, out_p), lambda i: (i, 0)),
        ),
        compiler_params=pltpu.CompilerParams(
            dimension_semantics=("parallel",),   # batch axis shards across TCs
            vmem_limit_bytes=vmem_limit,
        ),
    )


def generator_forward(x, condition, prepared, *, batch_tile=1024,
                      out_dtype=None, return_padded=False):
    """Equivalent of Generator.forward(x, condition) with prepared params."""
    B, input_size = x.shape
    Bc, condition_size = condition.shape
    assert B == Bc
    assert input_size + condition_size == prepared["in_total"]

    cd = prepared["compute_dtype"]
    in_total = prepared["in_total"]
    hidden_p = prepared["hidden_p"]
    out_p = prepared["out_p"]
    out_dim = prepared["out_dim"]
    if out_dtype is None:
        out_dtype = x.dtype

    # Fuse the concat once in the wrapper (tiny HBM cost) so the first layer is
    # a single K = input+cond matmul instead of two degenerate-K matmuls.
    xc = jnp.concatenate([x.astype(cd), condition.astype(cd)], axis=1)

    # ---- batch tiling ------------------------------------------------------
    sub = max(_sublane_multiple(cd), _sublane_multiple(out_dtype))
    bt = min(batch_tile, _round_up(B, sub))
    if B > sub:
        # Keep >= 2 grid steps where possible so both v7x TensorCores get work.
        bt = min(bt, _round_up(pl.cdiv(B, 2), sub))
    bt = _round_up(bt, sub)
    b_pad = _round_up(B, bt)
    if b_pad != B:
        xc = jnp.pad(xc, ((0, b_pad - B), (0, 0)))

    # ---- VMEM budget: actual footprint + headroom, not a blanket limit ------
    cd_sz = jnp.dtype(cd).itemsize
    out_sz = jnp.dtype(out_dtype).itemsize
    wbytes = sum(int(prepared[k].size) * prepared[k].dtype.itemsize
                 for k in ("w1", "b1", "w2", "b2", "w3", "b3"))
    act_bytes = 2 * bt * (in_total * cd_sz + out_p * out_sz)          # 2x-buffered I/O tiles
    tmp_bytes = bt * hidden_p * (2 * 4 + 2 * cd_sz) + bt * out_p * 4  # h1/h2 + casts + f32 out
    est = 2 * wbytes + act_bytes + tmp_bytes + (2 << 20)              # conservative (2x weights)
    # 32 MiB floor (>= scoped defaults, safe on v7x's 64 MiB); 96 MiB cap is for
    # large-hidden configs on v5e/v6e (128 MiB physical) -- v7x should instead
    # use the hidden-dim tiling TODO above for those configs.
    vmem_limit = max(32 << 20, min(int(est * 1.3), 96 << 20))

    args = (xc, prepared["w1"], prepared["b1"], prepared["w2"], prepared["b2"],
            prepared["w3"], prepared["b3"])

    want_buffered = hasattr(pl, "Buffered")
    try:
        out_padded = _build_pallas_call(
            bt, b_pad, in_total, hidden_p, out_p, out_dtype,
            vmem_limit, buffered_weights=want_buffered)(*args)
    except Exception:
        if not want_buffered:
            raise
        # Fallback: default double-buffered weight specs (still correct).
        out_padded = _build_pallas_call(
            bt, b_pad, in_total, hidden_p, out_p, out_dtype,
            vmem_limit, buffered_weights=False)(*args)

    if return_padded:
        return out_padded           # (b_pad, out_p); caller slices if needed
    return out_padded[:B, :out_dim]


# ------------------------------ reference ------------------------------------
def _reference_forward(x, condition, params):
    w1, b1, w2, b2, w3, b3 = params
    h = jnp.concatenate([x, condition], axis=1)
    h = jnp.maximum(h @ w1 + b1, 0.0)
    h = jnp.maximum(h @ w2 + b2, 0.0)
    return h @ w3 + b3


# --------------------------------- tests --------------------------------------
if __name__ == "__main__":
    input_size = 16       # latent size
    condition_size = 8
    hidden_size = 32
    output_size = 24

    key = jax.random.PRNGKey(0)
    kx, kc, kp = jax.random.split(key, 3)
    params = init_generator_params(kp, input_size, hidden_size, output_size,
                                   condition_size)

    prep_bf16 = prepare_params(params, compute_dtype=jnp.bfloat16)
    prep_f32 = prepare_params(params, compute_dtype=jnp.float32)

    # Case 1: default bf16 compute path, tiny batch (single grid step).
    batch = 8
    x = jax.random.normal(kx, (batch, input_size), jnp.float32)
    cond = jax.random.normal(kc, (batch, condition_size), jnp.float32)
    out = jax.block_until_ready(generator_forward(x, cond, prep_bf16))
    ref = _reference_forward(x, cond, params)
    assert out.shape == (batch, output_size)
    assert jnp.allclose(out, ref, atol=6e-2, rtol=6e-2), "mismatch (bf16, case 1)"

    # Case 2: bf16 path, non-trivial multi-step grid (exercises tiling + padding).
    batch2 = 48
    x2 = jax.random.normal(jax.random.PRNGKey(1), (batch2, input_size), jnp.float32)
    c2 = jax.random.normal(jax.random.PRNGKey(2), (batch2, condition_size), jnp.float32)
    out2 = jax.block_until_ready(
        generator_forward(x2, c2, prep_bf16, batch_tile=16))
    ref2 = _reference_forward(x2, c2, params)
    assert out2.shape == (batch2, output_size)
    assert jnp.allclose(out2, ref2, atol=6e-2, rtol=6e-2), "mismatch (bf16, case 2)"

    # Case 3: f32 compute path, non-multiple batch — exact numerical check.
    batch3 = 20
    x3 = jax.random.normal(jax.random.PRNGKey(3), (batch3, input_size), jnp.float32)
    c3 = jax.random.normal(jax.random.PRNGKey(4), (batch3, condition_size), jnp.float32)
    out3 = jax.block_until_ready(
        generator_forward(x3, c3, prep_f32, batch_tile=8))
    ref3 = _reference_forward(x3, c3, params)
    assert out3.shape == (batch3, output_size)
    assert jnp.allclose(out3, ref3, atol=1e-4, rtol=1e-4), "mismatch (f32, case 3)"

    print("KERNEL_OK")
</pallas_src>

<mosaic_0001>
module attributes {stable_mosaic.version = 11 : i64} {
  func.func @_generator_mlp_kernel(%arg0: i32, %arg1: memref<16x24xbf16, #tpu.memory_space<vmem>>, %arg2: memref<24x128xbf16, #tpu.memory_space<vmem>>, %arg3: memref<1x128xf32, #tpu.memory_space<vmem>>, %arg4: memref<128x128xbf16, #tpu.memory_space<vmem>>, %arg5: memref<1x128xf32, #tpu.memory_space<vmem>>, %arg6: memref<128x128xbf16, #tpu.memory_space<vmem>>, %arg7: memref<1x128xf32, #tpu.memory_space<vmem>>, %arg8: memref<16x128xf32, #tpu.memory_space<vmem>>) attributes {dimension_semantics = [#tpu.dimension_semantics<parallel>], iteration_bounds = array<i64: 1>, scalar_prefetch = 0 : i64, scratch_operands = 0 : i64, tpu.core_type = #tpu.core_type<tc>, window_params = [{transform_indices = @transform_0, window_bounds = array<i64: 16, 24>}, {pipeline_mode = #tpu.pipeline_mode<synchronous>, transform_indices = @transform_1, window_bounds = array<i64: 24, 128>}, {pipeline_mode = #tpu.pipeline_mode<synchronous>, transform_indices = @transform_2, window_bounds = array<i64: 1, 128>}, {pipeline_mode = #tpu.pipeline_mode<synchronous>, transform_indices = @transform_3, window_bounds = array<i64: 128, 128>}, {pipeline_mode = #tpu.pipeline_mode<synchronous>, transform_indices = @transform_4, window_bounds = array<i64: 1, 128>}, {pipeline_mode = #tpu.pipeline_mode<synchronous>, transform_indices = @transform_5, window_bounds = array<i64: 128, 128>}, {pipeline_mode = #tpu.pipeline_mode<synchronous>, transform_indices = @transform_6, window_bounds = array<i64: 1, 128>}, {transform_indices = @transform_7, window_bounds = array<i64: 16, 128>}]} {
    %c0 = arith.constant 0 : index
    %c0_0 = arith.constant 0 : index
    %0 = vector.load %arg1[%c0, %c0_0] : memref<16x24xbf16, #tpu.memory_space<vmem>>, vector<16x24xbf16>
    %c0_1 = arith.constant 0 : index
    %c0_2 = arith.constant 0 : index
    %1 = vector.load %arg2[%c0_1, %c0_2] : memref<24x128xbf16, #tpu.memory_space<vmem>>, vector<24x128xbf16>
    %cst = arith.constant dense<0.000000e+00> : vector<16x128xf32>
    %2 = tpu.matmul %0, %1, %cst {dimension_numbers = #tpu.dot_dimension_numbers<[1], [0], [0], [1], [0, 0, 1, 1], [], []>} : vector<16x24xbf16>, vector<24x128xbf16>, vector<16x128xf32> -> vector<16x128xf32>
    %c0_3 = arith.constant 0 : index
    %c0_4 = arith.constant 0 : index
    %3 = vector.load %arg3[%c0_3, %c0_4] : memref<1x128xf32, #tpu.memory_space<vmem>>, vector<1x128xf32>
    %4 = vector.broadcast %3 : vector<1x128xf32> to vector<16x128xf32>
    %5 = arith.addf %2, %4 : vector<16x128xf32>
    %cst_5 = arith.constant 0.000000e+00 : f32
    %6 = vector.broadcast %cst_5 : f32 to vector<16x128xf32>
    %7 = arith.maximumf %5, %6 : vector<16x128xf32>
    %8 = arith.truncf %7 : vector<16x128xf32> to vector<16x128xbf16>
    %c0_6 = arith.constant 0 : index
    %c0_7 = arith.constant 0 : index
    %9 = vector.load %arg4[%c0_6, %c0_7] : memref<128x128xbf16, #tpu.memory_space<vmem>>, vector<128x128xbf16>
    %cst_8 = arith.constant dense<0.000000e+00> : vector<16x128xf32>
    %10 = tpu.matmul %8, %9, %cst_8 {dimension_numbers = #tpu.dot_dimension_numbers<[1], [0], [0], [1], [0, 0, 1, 1], [], []>} : vector<16x128xbf16>, vector<128x128xbf16>, vector<16x128xf32> -> vector<16x128xf32>
    %c0_9 = arith.constant 0 : index
    %c0_10 = arith.constant 0 : index
    %11 = vector.load %arg5[%c0_9, %c0_10] : memref<1x128xf32, #tpu.memory_space<vmem>>, vector<1x128xf32>
    %12 = vector.broadcast %11 : vector<1x128xf32> to vector<16x128xf32>
    %13 = arith.addf %10, %12 : vector<16x128xf32>
    %cst_11 = arith.constant 0.000000e+00 : f32
    %14 = vector.broadcast %cst_11 : f32 to vector<16x128xf32>
    %15 = arith.maximumf %13, %14 : vector<16x128xf32>
    %16 = arith.truncf %15 : vector<16x128xf32> to vector<16x128xbf16>
    %c0_12 = arith.constant 0 : index
    %c0_13 = arith.constant 0 : index
    %17 = vector.load %arg6[%c0_12, %c0_13] : memref<128x128xbf16, #tpu.memory_space<vmem>>, vector<128x128xbf16>
    %cst_14 = arith.constant dense<0.000000e+00> : vector<16x128xf32>
    %18 = tpu.matmul %16, %17, %cst_14 {dimension_numbers = #tpu.dot_dimension_numbers<[1], [0], [0], [1], [0, 0, 1, 1], [], []>} : vector<16x128xbf16>, vector<128x128xbf16>, vector<16x128xf32> -> vector<16x128xf32>
    %c0_15 = arith.constant 0 : index
    %c0_16 = arith.constant 0 : index
    %19 = vector.load %arg7[%c0_15, %c0_16] : memref<1x128xf32, #tpu.memory_space<vmem>>, vector<1x128xf32>
    %20 = vector.broadcast %19 : vector<1x128xf32> to vector<16x128xf32>
    %21 = arith.addf %18, %20 : vector<16x128xf32>
    %c0_17 = arith.constant 0 : index
    %c0_18 = arith.constant 0 : index
    %22 = vector.load %arg8[%c0_17, %c0_18] : memref<16x128xf32, #tpu.memory_space<vmem>>, vector<16x128xf32>
    tpu.vector_store %arg8[%c0_17, %c0_18], %21 {strides = array<i32>} : memref<16x128xf32, #tpu.memory_space<vmem>>, vector<16x128xf32>,
    return
  }
  func.func @transform_0(%arg0: i32) -> (i32, i32) {
    %c0_i32 = arith.constant 0 : i32
    %c0_i32_0 = arith.constant 0 : i32
    return %arg0, %c0_i32 : i32, i32
  }
  func.func @transform_1(%arg0: i32) -> (i32, i32) {
    %c0_i32 = arith.constant 0 : i32
    %c0_i32_0 = arith.constant 0 : i32
    %c0_i32_1 = arith.constant 0 : i32
    return %c0_i32, %c0_i32_0 : i32, i32
  }
  func.func @transform_2(%arg0: i32) -> (i32, i32) {
    %c0_i32 = arith.constant 0 : i32
    %c0_i32_0 = arith.constant 0 : i32
    %c0_i32_1 = arith.constant 0 : i32
    return %c0_i32, %c0_i32_0 : i32, i32
  }
  func.func @transform_3(%arg0: i32) -> (i32, i32) {
    %c0_i32 = arith.constant 0 : i32
    %c0_i32_0 = arith.constant 0 : i32
    %c0_i32_1 = arith.constant 0 : i32
    return %c0_i32, %c0_i32_0 : i32, i32
  }
  func.func @transform_4(%arg0: i32) -> (i32, i32) {
    %c0_i32 = arith.constant 0 : i32
    %c0_i32_0 = arith.constant 0 : i32
    %c0_i32_1 = arith.constant 0 : i32
    return %c0_i32, %c0_i32_0 : i32, i32
  }
  func.func @transform_5(%arg0: i32) -> (i32, i32) {
    %c0_i32 = arith.constant 0 : i32
    %c0_i32_0 = arith.constant 0 : i32
    %c0_i32_1 = arith.constant 0 : i32
    return %c0_i32, %c0_i32_0 : i32, i32
  }
  func.func @transform_6(%arg0: i32) -> (i32, i32) {
    %c0_i32 = arith.constant 0 : i32
    %c0_i32_0 = arith.constant 0 : i32
    %c0_i32_1 = arith.constant 0 : i32
    return %c0_i32, %c0_i32_0 : i32, i32
  }
  func.func @transform_7(%arg0: i32) -> (i32, i32) {
    %c0_i32 = arith.constant 0 : i32
    %c0_i32_0 = arith.constant 0 : i32
    return %arg0, %c0_i32 : i32, i32
  }
}

module attributes {stable_mosaic.version = 11 : i64} {
  func.func @_generator_mlp_kernel(%arg0: i32, %arg1: memref<16x24xbf16, #tpu.memory_space<vmem>>, %arg2: memref<24x128xbf16, #tpu.memory_space<vmem>>, %arg3: memref<1x128xf32, #tpu.memory_space<vmem>>, %arg4: memref<128x128xbf16, #tpu.memory_space<vmem>>, %arg5: memref<1x128xf32, #tpu.memory_space<vmem>>, %arg6: memref<128x128xbf16, #tpu.memory_space<vmem>>, %arg7: memref<1x128xf32, #tpu.memory_space<vmem>>, %arg8: memref<16x128xf32, #tpu.memory_space<vmem>>) attributes {dimension_semantics = [#tpu.dimension_semantics<parallel>], iteration_bounds = array<i64: 1>, scalar_prefetch = 0 : i64, scratch_operands = 0 : i64, tpu.core_type = #tpu.core_type<tc>, window_params = [{transform_indices = @transform_0, window_bounds = array<i64: 16, 24>}, {pipeline_mode = #tpu.pipeline_mode<synchronous>, transform_indices = @transform_1, window_bounds = array<i64: 24, 128>}, {pipeline_mode = #tpu.pipeline_mode<synchronous>, transform_indices = @transform_2, window_bounds = array<i64: 1, 128>}, {pipeline_mode = #tpu.pipeline_mode<synchronous>, transform_indices = @transform_3, window_bounds = array<i64: 128, 128>}, {pipeline_mode = #tpu.pipeline_mode<synchronous>, transform_indices = @transform_4, window_bounds = array<i64: 1, 128>}, {pipeline_mode = #tpu.pipeline_mode<synchronous>, transform_indices = @transform_5, window_bounds = array<i64: 128, 128>}, {pipeline_mode = #tpu.pipeline_mode<synchronous>, transform_indices = @transform_6, window_bounds = array<i64: 1, 128>}, {transform_indices = @transform_7, window_bounds = array<i64: 16, 128>}]} {
    %c0 = arith.constant 0 : index
    %c0_0 = arith.constant 0 : index
    %0 = vector.load %arg1[%c0, %c0_0] : memref<16x24xbf16, #tpu.memory_space<vmem>>, vector<16x24xbf16>
    %c0_1 = arith.constant 0 : index
    %c0_2 = arith.constant 0 : index
    %1 = vector.load %arg2[%c0_1, %c0_2] : memref<24x128xbf16, #tpu.memory_space<vmem>>, vector<24x128xbf16>
    %cst = arith.constant dense<0.000000e+00> : vector<16x128xf32>
    %2 = tpu.matmul %0, %1, %cst {dimension_numbers = #tpu.dot_dimension_numbers<[1], [0], [0], [1], [0, 0, 1, 1], [], []>} : vector<16x24xbf16>, vector<24x128xbf16>, vector<16x128xf32> -> vector<16x128xf32>
    %c0_3 = arith.constant 0 : index
    %c0_4 = arith.constant 0 : index
    %3 = vector.load %arg3[%c0_3, %c0_4] : memref<1x128xf32, #tpu.memory_space<vmem>>, vector<1x128xf32>
    %4 = vector.broadcast %3 : vector<1x128xf32> to vector<16x128xf32>
    %5 = arith.addf %2, %4 : vector<16x128xf32>
    %cst_5 = arith.constant 0.000000e+00 : f32
    %6 = vector.broadcast %cst_5 : f32 to vector<16x128xf32>
    %7 = arith.maximumf %5, %6 : vector<16x128xf32>
    %8 = arith.truncf %7 : vector<16x128xf32> to vector<16x128xbf16>
    %c0_6 = arith.constant 0 : index
    %c0_7 = arith.constant 0 : index
    %9 = vector.load %arg4[%c0_6, %c0_7] : memref<128x128xbf16, #tpu.memory_space<vmem>>, vector<128x128xbf16>
    %cst_8 = arith.constant dense<0.000000e+00> : vector<16x128xf32>
    %10 = tpu.matmul %8, %9, %cst_8 {dimension_numbers = #tpu.dot_dimension_numbers<[1], [0], [0], [1], [0, 0, 1, 1], [], []>} : vector<16x128xbf16>, vector<128x128xbf16>, vector<16x128xf32> -> vector<16x128xf32>
    %c0_9 = arith.constant 0 : index
    %c0_10 = arith.constant 0 : index
    %11 = vector.load %arg5[%c0_9, %c0_10] : memref<1x128xf32, #tpu.memory_space<vmem>>, vector<1x128xf32>
    %12 = vector.broadcast %11 : vector<1x128xf32> to vector<16x128xf32>
    %13 = arith.addf %10, %12 : vector<16x128xf32>
    %cst_11 = arith.constant 0.000000e+00 : f32
    %14 = vector.broadcast %cst_11 : f32 to vector<16x128xf32>
    %15 = arith.maximumf %13, %14 : vector<16x128xf32>
    %16 = arith.truncf %15 : vector<16x128xf32> to vector<16x128xbf16>
    %c0_12 = arith.constant 0 : index
    %c0_13 = arith.constant 0 : index
    %17 = vector.load %arg6[%c0_12, %c0_13] : memref<128x128xbf16, #tpu.memory_space<vmem>>, vector<128x128xbf16>
    %cst_14 = arith.constant dense<0.000000e+00> : vector<16x128xf32>
    %18 = tpu.matmul %16, %17, %cst_14 {dimension_numbers = #tpu.dot_dimension_numbers<[1], [0], [0], [1], [0, 0, 1, 1], [], []>} : vector<16x128xbf16>, vector<128x128xbf16>, vector<16x128xf32> -> vector<16x128xf32>
    %c0_15 = arith.constant 0 : index
    %c0_16 = arith.constant 0 : index
    %19 = vector.load %arg7[%c0_15, %c0_16] : memref<1x128xf32, #tpu.memory_space<vmem>>, vector<1x128xf32>
    %20 = vector.broadcast %19 : vector<1x128xf32> to vector<16x128xf32>
    %21 = arith.addf %18, %20 : vector<16x128xf32>
    %c0_17 = arith.constant 0 : index
    %c0_18 = arith.constant 0 : index
    %22 = vector.load %arg8[%c0_17, %c0_18] : memref<16x128xf32, #tpu.memory_space<vmem>>, vector<16x128xf32>
    tpu.vector_store %arg8[%c0_17, %c0_18], %21 {strides = array<i32>} : memref<16x128xf32, #tpu.memory_space<vmem>>, vector<16x128xf32>,
    return
  }
  func.func @transform_0(%arg0: i32) -> (i32, i32) {
    %c0_i32 = arith.constant 0 : i32
    %c0_i32_0 = arith.constant 0 : i32
    return %arg0, %c0_i32 : i32, i32
  }
  func.func @transform_1(%arg0: i32) -> (i32, i32) {
    %c0_i32 = arith.constant 0 : i32
    %c0_i32_0 = arith.constant 0 : i32
    %c0_i32_1 = arith.constant 0 : i32
    return %c0_i32, %c0_i32_0 : i32, i32
  }
  func.func @transform_2(%arg0: i32) -> (i32, i32) {
    %c0_i32 = arith.constant 0 : i32
    %c0_i32_0 = arith.constant 0 : i32
    %c0_i32_1 = arith.constant 0 : i32
    return %c0_i32, %c0_i32_0 : i32, i32
  }
  func.func @transform_3(%arg0: i32) -> (i32, i32) {
    %c0_i32 = arith.constant 0 : i32
    %c0_i32_0 = arith.constant 0 : i32
    %c0_i32_1 = arith.constant 0 : i32
    return %c0_i32, %c0_i32_0 : i32, i32
  }
  func.func @transform_4(%arg0: i32) -> (i32, i32) {
    %c0_i32 = arith.constant 0 : i32
    %c0_i32_0 = arith.constant 0 : i32
    %c0_i32_1 = arith.constant 0 : i32
    return %c0_i32, %c0_i32_0 : i32, i32
  }
  func.func @transform_5(%arg0: i32) -> (i32, i32) {
    %c0_i32 = arith.constant 0 : i32
    %c0_i32_0 = arith.constant 0 : i32
    %c0_i32_1 = arith.constant 0 : i32
    return %c0_i32, %c0_i32_0 : i32, i32
  }
  func.func @transform_6(%arg0: i32) -> (i32, i32) {
    %c0_i32 = arith.constant 0 : i32
    %c0_i32_0 = arith.constant 0 : i32
    %c0_i32_1 = arith.constant 0 : i32
    return %c0_i32, %c0_i32_0 : i32, i32
  }
  func.func @transform_7(%arg0: i32) -> (i32, i32) {
    %c0_i32 = arith.constant 0 : i32
    %c0_i32_0 = arith.constant 0 : i32
    return %arg0, %c0_i32 : i32, i32
  }
}

</mosaic_0001>

<bundles_post_ra>
// kernel: tpu_custom_call.1
= control target key start
LH: loop header
LB: loop body
LE: loop exit
PB: predicated region body
PF: predicated region fallthrough
CT: control target
= control target key end

     0   :  { %12 = vsyncpa [#allocation3], 0  ;;  %s819_s0 = inlined_call_operand.hbm [shape: bf16[16,24], index: 0, kind: input, shape index: {}]   ;;  %s820_s1 = inlined_call_operand.hbm [shape: bf16[24,128], index: 1, kind: input, shape index: {}]   ;;  %s821_s2 = inlined_call_operand.vmem [shape: f32[1,128], index: 2, kind: input, shape index: {}]   ;;  %s822_s3 = inlined_call_operand.hbm [shape: bf16[128,128], index: 3, kind: input, shape index: {}]   ;;  %s823_s4 = inlined_call_operand.vmem [shape: f32[1,128], index: 4, kind: input, shape index: {}]   ;;  %s824_s5 = inlined_call_operand.hbm [shape: bf16[128,128], index: 5, kind: input, shape index: {}]   ;;  %s825_s6 = inlined_call_operand.vmem [shape: f32[1,128], index: 6, kind: input, shape index: {}]   ;;  %s826_s7 = inlined_call_operand.hbm [shape: f32[16,128], index: 7, kind: output, shape index: {}]  }
   0x1   :  { %13 = vsyncpa [#allocation6], 0 }
   0x2   :  { %14 = vsyncpa [#allocation9], 0 }
   0x3   :  { %15 = vsyncpa [#allocation4], 0  ;;  %s649_s24 = smov [#allocation5]   ;;  %s650_s26 = smov [#allocation2]  }
   0x4   :  { %s33_s25 = sshll.u32 %s649_s24, 4  ;;  %s21_s27 = sshll.u32 %s650_s26, 4  ;;  %s34_s25 = int_to_ptr.vmem [resolvable:$true] %s33_s25  ;;  %s700_s27 = int_to_ptr.vmem [resolvable:$true] %s21_s27 }
   0x5   :  { %s531_s30 = scalar_lea.hbm %s820_s1, 192 }
   0x6   :  { %p532_p0 = scmp.ne.s32.totalorder %s820_s1, %s531_s30  ;;  %p535_p1 = scmp.lt.u32.totalorder %s531_s30, %s820_s1 }
   0x8   :  { %p537_p2 = pnand %p535_p1, %p532_p0 }
   0xa   :  { %540 = shalt.err (!%p537_p2)
}
   0xb   :  { %s541_s12 = scalar_lea.vmem %s34_s25, 192  ;;  %p546_p4 = scmp.lt.s32.totalorder %s34_s25, %s34_s25 }
   0xc   :  { %p542_p3 = scmp.ne.s32.totalorder %s34_s25, %s541_s12  ;;  %p547_p5 = scmp.lt.s32.totalorder %s541_s12, %s541_s12 }
   0xe   :  { %p548_p6 = por %p547_p5, %p546_p4 }
  0x10   :  { %p549_p7 = pnand %p548_p6, %p542_p3 }
  0x12   :  { %552 = shalt.err (!%p549_p7)
}
  0x13   :  { %s651_s13 = smov 64   ;;  %s652_s14 = smov 4  }
  0x14   :  { %39 = dma.hbm_to_vmem [thread:$0]  %s820_s1, 192, %s34_s25, [#allocation6], %s651_s13, %s651_s13, %s652_s14  }
  0x15   :  { %s553_s19 = scalar_lea.hbm %s819_s0, 128 }
  0x16   :  { %p554_p8 = scmp.ne.s32.totalorder %s819_s0, %s553_s19  ;;  %p557_p9 = scmp.lt.u32.totalorder %s553_s19, %s819_s0 }
  0x18   :  { %p559_p10 = pnand %p557_p9, %p554_p8 }
  0x1a   :  { %562 = shalt.err (!%p559_p10)
}
  0x1b   :  { %s563_s24 = scalar_lea.vmem %s700_s27, 128  ;;  %p568_p12 = scmp.lt.s32.totalorder %s700_s27, %s700_s27 }
  0x1c   :  { %p564_p11 = scmp.ne.s32.totalorder %s700_s27, %s563_s24  ;;  %p569_p13 = scmp.lt.s32.totalorder %s563_s24, %s563_s24 }
  0x1e   :  { %p570_p0 = por %p569_p13, %p568_p12 }
  0x20   :  { %p571_p1 = pnand %p570_p0, %p564_p11 }
  0x22   :  { %574 = shalt.err (!%p571_p1)
}
  0x23   :  { %27 = dma.hbm_to_vmem [thread:$0]  %s819_s0, 128, %s700_s27, [#allocation3], %s651_s13, %s651_s13, %s652_s14  }
  0x24   :  { %s653_s26 = smov [#allocation7]   ;;  %s654_s29 = smov [#allocation8]  }
  0x25   :  { %s47_s28 = sshll.u32 %s653_s26, 4  ;;  %s61_s30 = sshll.u32 %s654_s29, 4  ;;  %s48_s28 = int_to_ptr.vmem [resolvable:$true] %s47_s28  ;;  %s737_s30 = int_to_ptr.vmem [resolvable:$true] %s61_s30 }
  0x26   :  { %s575_s10 = scalar_lea.hbm %s822_s3, 1024 }
  0x27   :  { %p576_p2 = scmp.ne.s32.totalorder %s822_s3, %s575_s10  ;;  %p579_p3 = scmp.lt.u32.totalorder %s575_s10, %s822_s3 }
  0x29   :  { %p581_p4 = pnand %p579_p3, %p576_p2 }
  0x2b   :  { %584 = shalt.err (!%p581_p4)
}
  0x2c   :  { %s585_s0 = scalar_lea.vmem %s48_s28, 1024  ;;  %p590_p6 = scmp.lt.s32.totalorder %s48_s28, %s48_s28 }
  0x2d   :  { %p586_p5 = scmp.ne.s32.totalorder %s48_s28, %s585_s0  ;;  %p591_p7 = scmp.lt.s32.totalorder %s585_s0, %s585_s0 }
  0x2f   :  { %p592_p8 = por %p591_p7, %p590_p6 }
  0x31   :  { %p593_p9 = pnand %p592_p8, %p586_p5 }
  0x33   :  { %596 = shalt.err (!%p593_p9)
}
  0x34   :  { %53 = dma.hbm_to_vmem [thread:$0]  %s822_s3, 1024, %s48_s28, [#allocation6], %s651_s13, %s651_s13, %s652_s14  }
  0x35   :  { %s597_s20 = scalar_lea.hbm %s824_s5, 1024 }
  0x36   :  { %p598_p10 = scmp.ne.s32.totalorder %s824_s5, %s597_s20  ;;  %p601_p11 = scmp.lt.u32.totalorder %s597_s20, %s824_s5 }
  0x38   :  { %p603_p12 = pnand %p601_p11, %p598_p10 }
  0x3a   :  { %606 = shalt.err (!%p603_p12)
}
  0x3b   :  { %s607_s1 = scalar_lea.vmem %s737_s30, 1024  ;;  %p612_p0 = scmp.lt.s32.totalorder %s737_s30, %s737_s30 }
  0x3c   :  { %p608_p13 = scmp.ne.s32.totalorder %s737_s30, %s607_s1  ;;  %p613_p1 = scmp.lt.s32.totalorder %s607_s1, %s607_s1 }
  0x3e   :  { %p614_p2 = por %p613_p1, %p612_p0 }
  0x40   :  { %p615_p3 = pnand %p614_p2, %p608_p13 }
  0x42   :  { %618 = shalt.err (!%p615_p3)
}
  0x43   :  { %67 = dma.hbm_to_vmem [thread:$0]  %s824_s5, 1024, %s737_s30, [#allocation9], %s651_s13, %s651_s13, %s652_s14  }
  0x44   :  { %641 = dma.done.wait [#allocation3], 128  }
  0x45   :  { %642 = vsyncadd [#allocation3], 4294967168 }
  0x46   :  { %643 = dma.done.wait [#allocation6], 1216  }
  0x47   :  { %644 = vsyncadd [#allocation6], 4294966080 }
  0x48   :  { %645 = dma.done.wait [#allocation9], 1024  }
  0x49   :  { %646 = vsyncadd [#allocation9], 4294966272  ;;  %v655_v0 = vmov 0.0   ;;  %vm656_vm0 = vmmov 0   ;;  %v512_v1 = vld [vmem:[#allocation5] sm:$0xff]   ;;  %vm113_vm1 = vcmask 1043456  }
  0x4a   :  { %453 = vmatprep.subr.bf16.mxu0 %v655_v0  ;;  %457 = vmatprep.mubr.msk.bf16.mxu0 %vm656_vm0, %v655_v0  ;;  %v513_v2 = vld [vmem:[#allocation5 + $0x8] ss:$0 sps:$4 sm:$0xff]   ;;  %v515_v4 = vld [vmem:[#allocation7] sm:$0xff]   ;;  %v514_v5 = vld [vmem:[#allocation2] sm:$0xff]   ;;  %vm109_vm2 = vcmask 195584   ;;  %s657_s29 = smov [#allocation10]  }
  0x4b   :  { %461 = vmatprep.subr.bf16.mxu1 %v655_v0  ;;  %477 = vmatprep.mubr.msk.bf16.mxu1 %vm656_vm0, %v655_v0  ;;  %v115_v3 = vsel %vm113_vm1, %v513_v2, 0  ;;  %v516_v6 = vld [vmem:[#allocation7 + $0x8] sm:$0xff]   ;;  %v517_v7 = vld [vmem:[#allocation7 + $0x10] sm:$0xff]   ;;  %v518_v8 = vld [vmem:[#allocation7 + $0x18] sm:$0xff]   ;;  %s395_s30 = sshll.u32 %s657_s29, 4  ;;  %s396_s30 = int_to_ptr.vmem [resolvable:$true] %s395_s30 }
  0x4c   :  { %454 = vmatpush3.bf16.msra.mxu0 %v512_v1  ;;  %462 = vmatpush3.bf16.msra.mxu1 %v515_v4  ;;  %v519_v9 = vld [vmem:[#allocation7 + $0x20] sm:$0xff]   ;;  %v520_v10 = vld [vmem:[#allocation7 + $0x28] sm:$0xff]   ;;  %v521_v11 = vld [vmem:[#allocation7 + $0x30] sm:$0xff]   ;;  %p624_p5 = scmp.lt.s32.totalorder %s396_s30, %s396_s30 }
  0x4d   :  { %455 = vmatprep.subr.bf16.mxu0 %v655_v0  ;;  %463 = vmatprep.subr.bf16.mxu1 %v655_v0  ;;  %v522_v12 = vld [vmem:[#allocation7 + $0x38] sm:$0xff]   ;;  %v523_v13 = vld [vmem:[#allocation8] sm:$0xff]   ;;  %v524_v14 = vld [vmem:[#allocation8 + $0x8] sm:$0xff]  }
  0x4e   :  { %v525_v15 = vld [vmem:[#allocation8 + $0x10] sm:$0xff]   ;;  %v526_v16 = vld [vmem:[#allocation8 + $0x18] sm:$0xff]   ;;  %v527_v17 = vld [vmem:[#allocation8 + $0x20] sm:$0xff]  }
  0x4f   :  { %v528_v18 = vld [vmem:[#allocation8 + $0x28] sm:$0xff]   ;;  %v529_v29 = vld [vmem:[#allocation8 + $0x30] sm:$0xff]   ;;  %v530_v30 = vld [vmem:[#allocation8 + $0x38] sm:$0xff]  }
  0x50   :  { %456 = vmatpush3.bf16.msra.mxu0 %v115_v3  ;;  %464 = vmatpush3.bf16.msra.mxu1 %v516_v6  ;;  %v409_v19 = vld [vmem:[%s821_s2] ss:$0 sm:$0xff] }
  0x51   :  { %481 = vmatprep.subr.bf16.mxu0 %v655_v0  ;;  %465 = vmatprep.subr.bf16.mxu1 %v655_v0  ;;  %v414_v31 = vld [vmem:[%s823_s4] ss:$0 sm:$0xff]  ;;  %s619_s4 = scalar_lea.vmem %s396_s30, 256 }
  0x52   :  { %v423_v41 = vld [vmem:[%s825_s6] ss:$0 sm:$0xff]  ;;  %p620_p4 = scmp.ne.s32.totalorder %s396_s30, %s619_s4  ;;  %p625_p6 = scmp.lt.s32.totalorder %s619_s4, %s619_s4 }
  0x53   :  { %458 = vmatmul.mubr.msk.bf16.vlgmr.msra.gmra.mrb[0].mxu0 %vm109_vm2, %v514_v5 }
  0x54   :  { %497 = vmatprep.mubr.msk.bf16.mxu0 %vm656_vm0, %v655_v0  ;;  %466 = vmatpush3.bf16.msra.mxu1 %v517_v7  ;;  %p626_p7 = por %p625_p6, %p624_p5 }
  0x55   :  { %467 = vmatprep.subr.bf16.mxu1 %v655_v0  ;;  %482 = vmatpush3.bf16.msra.mxu0 %v523_v13 }
  0x56   :  { %483 = vmatprep.subr.bf16.mxu0 %v655_v0  ;;  %p627_p8 = pnand %p626_p7, %p620_p4 }
  0x58   :  { %468 = vmatpush3.bf16.msra.mxu1 %v518_v8 }
  0x59   :  { %469 = vmatprep.subr.bf16.mxu1 %v655_v0  ;;  %484 = vmatpush3.bf16.msra.mxu0 %v524_v14 }
  0x5a   :  { %485 = vmatprep.subr.bf16.mxu0 %v655_v0 }
  0x5c   :  { %470 = vmatpush3.bf16.msra.mxu1 %v519_v9 }
  0x5d   :  { %471 = vmatprep.subr.bf16.mxu1 %v655_v0  ;;  %486 = vmatpush3.bf16.msra.mxu0 %v525_v15 }
  0x5e   :  { %487 = vmatprep.subr.bf16.mxu0 %v655_v0 }
  0x60   :  { %472 = vmatpush3.bf16.msra.mxu1 %v520_v10 }
  0x61   :  { %473 = vmatprep.subr.bf16.mxu1 %v655_v0  ;;  %488 = vmatpush3.bf16.msra.mxu0 %v526_v16 }
  0x62   :  { %489 = vmatprep.subr.bf16.mxu0 %v655_v0 }
  0x64   :  { %474 = vmatpush3.bf16.msra.mxu1 %v521_v11 }
  0x65   :  { %475 = vmatprep.subr.bf16.mxu1 %v655_v0  ;;  %490 = vmatpush3.bf16.msra.mxu0 %v527_v17 }
  0x66   :  { %491 = vmatprep.subr.bf16.mxu0 %v655_v0 }
  0x68   :  { %476 = vmatpush3.bf16.msra.mxu1 %v522_v12 }
  0x69   :  { %492 = vmatpush3.bf16.msra.mxu0 %v528_v18 }
  0x6a   :  { %493 = vmatprep.subr.bf16.mxu0 %v655_v0 }
  0x6d   :  { %494 = vmatpush3.bf16.msra.mxu0 %v529_v29 }
  0x6e   :  { %495 = vmatprep.subr.bf16.mxu0 %v655_v0 }
  0x71   :  { %496 = vmatpush3.bf16.msra.mxu0 %v530_v30 }
 0x126   :  { %v151_v20 = vpop.f32.mrb[0].mxu0 }
 0x127   :  { %v152_v21 = vadd.f32 %v409_v19, %v151_v20  ;;  %v459_v22 = vpop.f32.mrb[1].mxu0 }
 0x128   :  { %v154_v23 = vpop.f32.mrb[2].mxu0 }
 0x129   :  { %v155_v24 = vadd.f32 %v409_v19, %v154_v23  ;;  %v460_v25 = vpop.f32.mrb[3].mxu0  ;;  %v158_v26 = vmax.f32 %v152_v21, 0.0 }
 0x12b   :  { %v159_v27 = vmax.f32 %v155_v24, 0.0 }
 0x12d   :  { %v160_v28 = vpack.c.bf16 %v159_v27, %v158_v26 }
 0x12f   :  { %478 = vmatmul.mubr.bf16.vlgmr.msra.gmra.mrb[0].mxu1 %v160_v28 }
 0x202   :  { %v266_v32 = vpop.f32.mrb[0].mxu1 }
 0x203   :  { %v267_v33 = vadd.f32 %v414_v31, %v266_v32  ;;  %v479_v34 = vpop.f32.mrb[1].mxu1 }
 0x204   :  { %v269_v35 = vpop.f32.mrb[2].mxu1 }
 0x205   :  { %v270_v36 = vadd.f32 %v414_v31, %v269_v35  ;;  %v480_v37 = vpop.f32.mrb[3].mxu1  ;;  %v273_v38 = vmax.f32 %v267_v33, 0.0 }
 0x207   :  { %v274_v39 = vmax.f32 %v270_v36, 0.0 }
 0x209   :  { %v275_v40 = vpack.c.bf16 %v274_v39, %v273_v38 }
 0x20b   :  { %498 = vmatmul.mubr.bf16.vlgmr.msra.gmra.mrb[4].mxu0 %v275_v40 }
 0x2de   :  { %v381_v42 = vpop.f32.mrb[4].mxu0 }
 0x2df   :  { %v382_v43 = vadd.f32 %v423_v41, %v381_v42  ;;  %v499_v44 = vpop.f32.mrb[5].mxu0 }
 0x2e0   :  { %v384_v45 = vpop.f32.mrb[6].mxu0 }
 0x2e1   :  { %388 = vst [vmem:[#allocation10] sm:$0xff] %v382_v43  ;;  %v385_v46 = vadd.f32 %v423_v41, %v384_v45  ;;  %v500_v47 = vpop.f32.mrb[7].mxu0 }
 0x2e3   :  { %389 = vst [vmem:[#allocation10 + $0x8] sm:$0xff] %v385_v46 }
 0x2e4   :  { %630 = shalt.err (!%p627_p8)
}
 0x2e5   :  { %s631_s9 = scalar_lea.hbm %s826_s7, 256 }
 0x2e6   :  { %p632_p9 = scmp.ne.s32.totalorder %s826_s7, %s631_s9  ;;  %p635_p10 = scmp.lt.u32.totalorder %s631_s9, %s826_s7 }
 0x2e8   :  { %p637_p11 = pnand %p635_p10, %p632_p9 }
 0x2ea   :  { %640 = shalt.err (!%p637_p11)
}
 0x2eb   :  { %s658_s16 = smov 128   ;;  %s659_s0 = smov 8  }
 0x2ec   :  { %401 = dma.vmem_to_hbm [thread:$0]  %s396_s30, 256, %s826_s7, [#allocation4], %s658_s16, %s658_s16, %s659_s0  }
 0x2ed   :  { %647 = dma.done.wait [#allocation4], 256  }
 0x2ee   :  { %648 = vsyncadd [#allocation4], 4294967040 }
 0x2ef   :  { %405 = vsyncpa [#allocation3], 1 }
 0x2f0   :  { %406 = vsyncpa [#allocation6], 1 }
 0x2f1   :  { %407 = vsyncpa [#allocation9], 1 }
 0x2f2   :  { %408 = vsyncpa [#allocation4], 1 }

// kernel: tpu_custom_call.1
= control target key start
LH: loop header
LB: loop body
LE: loop exit
PB: predicated region body
PF: predicated region fallthrough
CT: control target
= control target key end

     0   :  { %12 = vsyncpa [#allocation3], 0  ;;  %s819_s0 = inlined_call_operand.hbm [shape: bf16[16,24], index: 0, kind: input, shape index: {}]   ;;  %s820_s1 = inlined_call_operand.hbm [shape: bf16[24,128], index: 1, kind: input, shape index: {}]   ;;  %s821_s2 = inlined_call_operand.vmem [shape: f32[1,128], index: 2, kind: input, shape index: {}]   ;;  %s822_s3 = inlined_call_operand.hbm [shape: bf16[128,128], index: 3, kind: input, shape index: {}]   ;;  %s823_s4 = inlined_call_operand.vmem [shape: f32[1,128], index: 4, kind: input, shape index: {}]   ;;  %s824_s5 = inlined_call_operand.hbm [shape: bf16[128,128], index: 5, kind: input, shape index: {}]   ;;  %s825_s6 = inlined_call_operand.vmem [shape: f32[1,128], index: 6, kind: input, shape index: {}]   ;;  %s826_s7 = inlined_call_operand.hbm [shape: f32[16,128], index: 7, kind: output, shape index: {}]  }
   0x1   :  { %13 = vsyncpa [#allocation6], 0 }
   0x2   :  { %14 = vsyncpa [#allocation9], 0 }
   0x3   :  { %15 = vsyncpa [#allocation4], 0  ;;  %s649_s24 = smov [#allocation5]   ;;  %s650_s26 = smov [#allocation2]  }
   0x4   :  { %s33_s25 = sshll.u32 %s649_s24, 4  ;;  %s21_s27 = sshll.u32 %s650_s26, 4  ;;  %s34_s25 = int_to_ptr.vmem [resolvable:$true] %s33_s25  ;;  %s700_s27 = int_to_ptr.vmem [resolvable:$true] %s21_s27 }
   0x5   :  { %s531_s30 = scalar_lea.hbm %s820_s1, 192 }
   0x6   :  { %p532_p0 = scmp.ne.s32.totalorder %s820_s1, %s531_s30  ;;  %p535_p1 = scmp.lt.u32.totalorder %s531_s30, %s820_s1 }
   0x8   :  { %p537_p2 = pnand %p535_p1, %p532_p0 }
   0xa   :  { %540 = shalt.err (!%p537_p2)
}
   0xb   :  { %s541_s12 = scalar_lea.vmem %s34_s25, 192  ;;  %p546_p4 = scmp.lt.s32.totalorder %s34_s25, %s34_s25 }
   0xc   :  { %p542_p3 = scmp.ne.s32.totalorder %s34_s25, %s541_s12  ;;  %p547_p5 = scmp.lt.s32.totalorder %s541_s12, %s541_s12 }
   0xe   :  { %p548_p6 = por %p547_p5, %p546_p4 }
  0x10   :  { %p549_p7 = pnand %p548_p6, %p542_p3 }
  0x12   :  { %552 = shalt.err (!%p549_p7)
}
  0x13   :  { %s651_s13 = smov 64   ;;  %s652_s14 = smov 4  }
  0x14   :  { %39 = dma.hbm_to_vmem [thread:$0]  %s820_s1, 192, %s34_s25, [#allocation6], %s651_s13, %s651_s13, %s652_s14  }
  0x15   :  { %s553_s19 = scalar_lea.hbm %s819_s0, 128 }
  0x16   :  { %p554_p8 = scmp.ne.s32.totalorder %s819_s0, %s553_s19  ;;  %p557_p9 = scmp.lt.u32.totalorder %s553_s19, %s819_s0 }
  0x18   :  { %p559_p10 = pnand %p557_p9, %p554_p8 }
  0x1a   :  { %562 = shalt.err (!%p559_p10)
}
  0x1b   :  { %s563_s24 = scalar_lea.vmem %s700_s27, 128  ;;  %p568_p12 = scmp.lt.s32.totalorder %s700_s27, %s700_s27 }
  0x1c   :  { %p564_p11 = scmp.ne.s32.totalorder %s700_s27, %s563_s24  ;;  %p569_p13 = scmp.lt.s32.totalorder %s563_s24, %s563_s24 }
  0x1e   :  { %p570_p0 = por %p569_p13, %p568_p12 }
  0x20   :  { %p571_p1 = pnand %p570_p0, %p564_p11 }
  0x22   :  { %574 = shalt.err (!%p571_p1)
}
  0x23   :  { %27 = dma.hbm_to_vmem [thread:$0]  %s819_s0, 128, %s700_s27, [#allocation3], %s651_s13, %s651_s13, %s652_s14  }
  0x24   :  { %s653_s26 = smov [#allocation7]   ;;  %s654_s29 = smov [#allocation8]  }
  0x25   :  { %s47_s28 = sshll.u32 %s653_s26, 4  ;;  %s61_s30 = sshll.u32 %s654_s29, 4  ;;  %s48_s28 = int_to_ptr.vmem [resolvable:$true] %s47_s28  ;;  %s737_s30 = int_to_ptr.vmem [resolvable:$true] %s61_s30 }
  0x26   :  { %s575_s10 = scalar_lea.hbm %s822_s3, 1024 }
  0x27   :  { %p576_p2 = scmp.ne.s32.totalorder %s822_s3, %s575_s10  ;;  %p579_p3 = scmp.lt.u32.totalorder %s575_s10, %s822_s3 }
  0x29   :  { %p581_p4 = pnand %p579_p3, %p576_p2 }
  0x2b   :  { %584 = shalt.err (!%p581_p4)
}
  0x2c   :  { %s585_s0 = scalar_lea.vmem %s48_s28, 1024  ;;  %p590_p6 = scmp.lt.s32.totalorder %s48_s28, %s48_s28 }
  0x2d   :  { %p586_p5 = scmp.ne.s32.totalorder %s48_s28, %s585_s0  ;;  %p591_p7 = scmp.lt.s32.totalorder %s585_s0, %s585_s0 }
  0x2f   :  { %p592_p8 = por %p591_p7, %p590_p6 }
  0x31   :  { %p593_p9 = pnand %p592_p8, %p586_p5 }
  0x33   :  { %596 = shalt.err (!%p593_p9)
}
  0x34   :  { %53 = dma.hbm_to_vmem [thread:$0]  %s822_s3, 1024, %s48_s28, [#allocation6], %s651_s13, %s651_s13, %s652_s14  }
  0x35   :  { %s597_s20 = scalar_lea.hbm %s824_s5, 1024 }
  0x36   :  { %p598_p10 = scmp.ne.s32.totalorder %s824_s5, %s597_s20  ;;  %p601_p11 = scmp.lt.u32.totalorder %s597_s20, %s824_s5 }
  0x38   :  { %p603_p12 = pnand %p601_p11, %p598_p10 }
  0x3a   :  { %606 = shalt.err (!%p603_p12)
}
  0x3b   :  { %s607_s1 = scalar_lea.vmem %s737_s30, 1024  ;;  %p612_p0 = scmp.lt.s32.totalorder %s737_s30, %s737_s30 }
  0x3c   :  { %p608_p13 = scmp.ne.s32.totalorder %s737_s30, %s607_s1  ;;  %p613_p1 = scmp.lt.s32.totalorder %s607_s1, %s607_s1 }
  0x3e   :  { %p614_p2 = por %p613_p1, %p612_p0 }
  0x40   :  { %p615_p3 = pnand %p614_p2, %p608_p13 }
  0x42   :  { %618 = shalt.err (!%p615_p3)
}
  0x43   :  { %67 = dma.hbm_to_vmem [thread:$0]  %s824_s5, 1024, %s737_s30, [#allocation9], %s651_s13, %s651_s13, %s652_s14  }
  0x44   :  { %641 = dma.done.wait [#allocation3], 128  }
  0x45   :  { %642 = vsyncadd [#allocation3], 4294967168 }
  0x46   :  { %643 = dma.done.wait [#allocation6], 1216  }
  0x47   :  { %644 = vsyncadd [#allocation6], 4294966080 }
  0x48   :  { %645 = dma.done.wait [#allocation9], 1024  }
  0x49   :  { %646 = vsyncadd [#allocation9], 4294966272  ;;  %v655_v0 = vmov 0.0   ;;  %vm656_vm0 = vmmov 0   ;;  %v512_v1 = vld [vmem:[#allocation5] sm:$0xff]   ;;  %vm113_vm1 = vcmask 1043456  }
  0x4a   :  { %453 = vmatprep.subr.bf16.mxu0 %v655_v0  ;;  %457 = vmatprep.mubr.msk.bf16.mxu0 %vm656_vm0, %v655_v0  ;;  %v513_v2 = vld [vmem:[#allocation5 + $0x8] ss:$0 sps:$4 sm:$0xff]   ;;  %v515_v4 = vld [vmem:[#allocation7] sm:$0xff]   ;;  %v514_v5 = vld [vmem:[#allocation2] sm:$0xff]   ;;  %vm109_vm2 = vcmask 195584   ;;  %s657_s29 = smov [#allocation10]  }
  0x4b   :  { %461 = vmatprep.subr.bf16.mxu1 %v655_v0  ;;  %477 = vmatprep.mubr.msk.bf16.mxu1 %vm656_vm0, %v655_v0  ;;  %v115_v3 = vsel %vm113_vm1, %v513_v2, 0  ;;  %v516_v6 = vld [vmem:[#allocation7 + $0x8] sm:$0xff]   ;;  %v517_v7 = vld [vmem:[#allocation7 + $0x10] sm:$0xff]   ;;  %v518_v8 = vld [vmem:[#allocation7 + $0x18] sm:$0xff]   ;;  %s395_s30 = sshll.u32 %s657_s29, 4  ;;  %s396_s30 = int_to_ptr.vmem [resolvable:$true] %s395_s30 }
  0x4c   :  { %454 = vmatpush3.bf16.msra.mxu0 %v512_v1  ;;  %462 = vmatpush3.bf16.msra.mxu1 %v515_v4  ;;  %v519_v9 = vld [vmem:[#allocation7 + $0x20] sm:$0xff]   ;;  %v520_v10 = vld [vmem:[#allocation7 + $0x28] sm:$0xff]   ;;  %v521_v11 = vld [vmem:[#allocation7 + $0x30] sm:$0xff]   ;;  %p624_p5 = scmp.lt.s32.totalorder %s396_s30, %s396_s30 }
  0x4d   :  { %455 = vmatprep.subr.bf16.mxu0 %v655_v0  ;;  %463 = vmatprep.subr.bf16.mxu1 %v655_v0  ;;  %v522_v12 = vld [vmem:[#allocation7 + $0x38] sm:$0xff]   ;;  %v523_v13 = vld [vmem:[#allocation8] sm:$0xff]   ;;  %v524_v14 = vld [vmem:[#allocation8 + $0x8] sm:$0xff]  }
  0x4e   :  { %v525_v15 = vld [vmem:[#allocation8 + $0x10] sm:$0xff]   ;;  %v526_v16 = vld [vmem:[#allocation8 + $0x18] sm:$0xff]   ;;  %v527_v17 = vld [vmem:[#allocation8 + $0x20] sm:$0xff]  }
  0x4f   :  { %v528_v18 = vld [vmem:[#allocation8 + $0x28] sm:$0xff]   ;;  %v529_v29 = vld [vmem:[#allocation8 + $0x30] sm:$0xff]   ;;  %v530_v30 = vld [vmem:[#allocation8 + $0x38] sm:$0xff]  }
  0x50   :  { %456 = vmatpush3.bf16.msra.mxu0 %v115_v3  ;;  %464 = vmatpush3.bf16.msra.mxu1 %v516_v6  ;;  %v409_v19 = vld [vmem:[%s821_s2] ss:$0 sm:$0xff] }
  0x51   :  { %481 = vmatprep.subr.bf16.mxu0 %v655_v0  ;;  %465 = vmatprep.subr.bf16.mxu1 %v655_v0  ;;  %v414_v31 = vld [vmem:[%s823_s4] ss:$0 sm:$0xff]  ;;  %s619_s4 = scalar_lea.vmem %s396_s30, 256 }
  0x52   :  { %v423_v41 = vld [vmem:[%s825_s6] ss:$0 sm:$0xff]  ;;  %p620_p4 = scmp.ne.s32.totalorder %s396_s30, %s619_s4  ;;  %p625_p6 = scmp.lt.s32.totalorder %s619_s4, %s619_s4 }
  0x53   :  { %458 = vmatmul.mubr.msk.bf16.vlgmr.msra.gmra.mrb[0].mxu0 %vm109_vm2, %v514_v5 }
  0x54   :  { %497 = vmatprep.mubr.msk.bf16.mxu0 %vm656_vm0, %v655_v0  ;;  %466 = vmatpush3.bf16.msra.mxu1 %v517_v7  ;;  %p626_p7 = por %p625_p6, %p624_p5 }
  0x55   :  { %467 = vmatprep.subr.bf16.mxu1 %v655_v0  ;;  %482 = vmatpush3.bf16.msra.mxu0 %v523_v13 }
  0x56   :  { %483 = vmatprep.subr.bf16.mxu0 %v655_v0  ;;  %p627_p8 = pnand %p626_p7, %p620_p4 }
  0x58   :  { %468 = vmatpush3.bf16.msra.mxu1 %v518_v8 }
  0x59   :  { %469 = vmatprep.subr.bf16.mxu1 %v655_v0  ;;  %484 = vmatpush3.bf16.msra.mxu0 %v524_v14 }
  0x5a   :  { %485 = vmatprep.subr.bf16.mxu0 %v655_v0 }
  0x5c   :  { %470 = vmatpush3.bf16.msra.mxu1 %v519_v9 }
  0x5d   :  { %471 = vmatprep.subr.bf16.mxu1 %v655_v0  ;;  %486 = vmatpush3.bf16.msra.mxu0 %v525_v15 }
  0x5e   :  { %487 = vmatprep.subr.bf16.mxu0 %v655_v0 }
  0x60   :  { %472 = vmatpush3.bf16.msra.mxu1 %v520_v10 }
  0x61   :  { %473 = vmatprep.subr.bf16.mxu1 %v655_v0  ;;  %488 = vmatpush3.bf16.msra.mxu0 %v526_v16 }
  0x62   :  { %489 = vmatprep.subr.bf16.mxu0 %v655_v0 }
  0x64   :  { %474 = vmatpush3.bf16.msra.mxu1 %v521_v11 }
  0x65   :  { %475 = vmatprep.subr.bf16.mxu1 %v655_v0  ;;  %490 = vmatpush3.bf16.msra.mxu0 %v527_v17 }
  0x66   :  { %491 = vmatprep.subr.bf16.mxu0 %v655_v0 }
  0x68   :  { %476 = vmatpush3.bf16.msra.mxu1 %v522_v12 }
  0x69   :  { %492 = vmatpush3.bf16.msra.mxu0 %v528_v18 }
  0x6a   :  { %493 = vmatprep.subr.bf16.mxu0 %v655_v0 }
  0x6d   :  { %494 = vmatpush3.bf16.msra.mxu0 %v529_v29 }
  0x6e   :  { %495 = vmatprep.subr.bf16.mxu0 %v655_v0 }
  0x71   :  { %496 = vmatpush3.bf16.msra.mxu0 %v530_v30 }
 0x126   :  { %v151_v20 = vpop.f32.mrb[0].mxu0 }
 0x127   :  { %v152_v21 = vadd.f32 %v409_v19, %v151_v20  ;;  %v459_v22 = vpop.f32.mrb[1].mxu0 }
 0x128   :  { %v154_v23 = vpop.f32.mrb[2].mxu0 }
 0x129   :  { %v155_v24 = vadd.f32 %v409_v19, %v154_v23  ;;  %v460_v25 = vpop.f32.mrb[3].mxu0  ;;  %v158_v26 = vmax.f32 %v152_v21, 0.0 }
 0x12b   :  { %v159_v27 = vmax.f32 %v155_v24, 0.0 }
 0x12d   :  { %v160_v28 = vpack.c.bf16 %v159_v27, %v158_v26 }
 0x12f   :  { %478 = vmatmul.mubr.bf16.vlgmr.msra.gmra.mrb[0].mxu1 %v160_v28 }
 0x202   :  { %v266_v32 = vpop.f32.mrb[0].mxu1 }
 0x203   :  { %v267_v33 = vadd.f32 %v414_v31, %v266_v32  ;;  %v479_v34 = vpop.f32.mrb[1].mxu1 }
 0x204   :  { %v269_v35 = vpop.f32.mrb[2].mxu1 }
 0x205   :  { %v270_v36 = vadd.f32 %v414_v31, %v269_v35  ;;  %v480_v37 = vpop.f32.mrb[3].mxu1  ;;  %v273_v38 = vmax.f32 %v267_v33, 0.0 }
 0x207   :  { %v274_v39 = vmax.f32 %v270_v36, 0.0 }
 0x209   :  { %v275_v40 = vpack.c.bf16 %v274_v39, %v273_v38 }
 0x20b   :  { %498 = vmatmul.mubr.bf16.vlgmr.msra.gmra.mrb[4].mxu0 %v275_v40 }
 0x2de   :  { %v381_v42 = vpop.f32.mrb[4].mxu0 }
 0x2df   :  { %v382_v43 = vadd.f32 %v423_v41, %v381_v42  ;;  %v499_v44 = vpop.f32.mrb[5].mxu0 }
 0x2e0   :  { %v384_v45 = vpop.f32.mrb[6].mxu0 }
 0x2e1   :  { %388 = vst [vmem:[#allocation10] sm:$0xff] %v382_v43  ;;  %v385_v46 = vadd.f32 %v423_v41, %v384_v45  ;;  %v500_v47 = vpop.f32.mrb[7].mxu0 }
 0x2e3   :  { %389 = vst [vmem:[#allocation10 + $0x8] sm:$0xff] %v385_v46 }
 0x2e4   :  { %630 = shalt.err (!%p627_p8)
}
 0x2e5   :  { %s631_s9 = scalar_lea.hbm %s826_s7, 256 }
 0x2e6   :  { %p632_p9 = scmp.ne.s32.totalorder %s826_s7, %s631_s9  ;;  %p635_p10 = scmp.lt.u32.totalorder %s631_s9, %s826_s7 }
 0x2e8   :  { %p637_p11 = pnand %p635_p10, %p632_p9 }
 0x2ea   :  { %640 = shalt.err (!%p637_p11)
}
 0x2eb   :  { %s658_s16 = smov 128   ;;  %s659_s0 = smov 8  }
 0x2ec   :  { %401 = dma.vmem_to_hbm [thread:$0]  %s396_s30, 256, %s826_s7, [#allocation4], %s658_s16, %s658_s16, %s659_s0  }
 0x2ed   :  { %647 = dma.done.wait [#allocation4], 256  }
 0x2ee   :  { %648 = vsyncadd [#allocation4], 4294967040 }
 0x2ef   :  { %405 = vsyncpa [#allocation3], 1 }
 0x2f0   :  { %406 = vsyncpa [#allocation6], 1 }
 0x2f1   :  { %407 = vsyncpa [#allocation9], 1 }
 0x2f2   :  { %408 = vsyncpa [#allocation4], 1 }

</bundles_post_ra>
